<compile_context>
chip_gen: v7x
topology: tpu7x:2x2x1
jax: 0.10.0
libtpu: 0.0.40
codegen_flags: <defaults>
</compile_context>

<pallas_src>
import jax
import jax.numpy as jnp
from jax.experimental import pallas as pl
from jax.experimental.pallas import tpu as pltpu


def _round_up(n, m):
    return ((n + m - 1) // m) * m


# --------------------------------------------------------------------------
# Kernels
# --------------------------------------------------------------------------
def _ffn_kernel_resident(x_ref, w1_ref, b1_ref, w2_ref, b2_ref, o_ref):
    # x: (TM, Din) act dtype; w1: (Din, Dmid) bf16; b1: (1, Dmid) f32;
    # w2: (Dmid, Dout) bf16; b2: (1, Dout) f32; o: (TM, Dout) act dtype.
    x = x_ref[...].astype(jnp.bfloat16)                  # cast only at the dot input
    h = jnp.dot(x, w1_ref[...], preferred_element_type=jnp.float32)
    h = jnp.maximum(h + b1_ref[...], 0.0)                # bias + ReLU in f32 (VPU)
    # TODO(synk): dropout (DROPOUT_R) is identity in eval mode; not applied.
    out = jnp.dot(h.astype(jnp.bfloat16), w2_ref[...],
                  preferred_element_type=jnp.float32)
    o_ref[...] = (out + b2_ref[...]).astype(o_ref.dtype)


def _ffn_kernel_chunked(x_ref, w1_ref, b1_ref, w2_ref, b2_ref, o_ref, acc_ref):
    # Reduction over FF chunks: per chunk  relu(x@W1[:,k] + b1[k]) @ W2[k,:]
    # accumulated into an f32 VMEM scratch (exact: second matmul sums over FF).
    k = pl.program_id(1)

    @pl.when(k == 0)
    def _():
        acc_ref[...] = jnp.zeros_like(acc_ref)

    x = x_ref[...].astype(jnp.bfloat16)
    h = jnp.dot(x, w1_ref[...], preferred_element_type=jnp.float32)
    h = jnp.maximum(h + b1_ref[...], 0.0)
    acc_ref[...] += jnp.dot(h.astype(jnp.bfloat16), w2_ref[...],
                            preferred_element_type=jnp.float32)

    @pl.when(k == pl.num_programs(1) - 1)
    def _():
        o_ref[...] = (acc_ref[...] + b2_ref[...]).astype(o_ref.dtype)


# --------------------------------------------------------------------------
# One-time capability probe: single-buffered (resident) constant operands.
# --------------------------------------------------------------------------
_BUFFERED1_OK = None


def _single_buffer_supported():
    global _BUFFERED1_OK
    if _BUFFERED1_OK is None:
        try:
            def _probe_kernel(a_ref, o_ref):
                o_ref[...] = a_ref[...] + 1.0

            probe = pl.pallas_call(
                _probe_kernel,
                out_shape=jax.ShapeDtypeStruct((16, 128), jnp.float32),
                grid=(2,),
                in_specs=[pl.BlockSpec((8, 128), lambda i: (0, 0),
                                       pipeline_mode=pl.Buffered(1))],
                out_specs=pl.BlockSpec((8, 128), lambda i: (i, 0)),
            )
            jax.jit(probe).lower(jnp.zeros((8, 128), jnp.float32)).compile()
            _BUFFERED1_OK = True
        except Exception:
            _BUFFERED1_OK = False
    return _BUFFERED1_OK


# --------------------------------------------------------------------------
# pallas_call builders
# --------------------------------------------------------------------------
def _build_call_resident(m_pad, tile_m, d_in, d_mid, d_out, out_dtype,
                         vmem_limit_bytes, single_buffer_weights):
    # Constant-index operands (weights/biases) are fetched once; single-buffer
    # them when supported so their resident VMEM footprint is not doubled.
    w_kw = {"pipeline_mode": pl.Buffered(1)} if single_buffer_weights else {}
    const = lambda i: (0, 0)
    return pl.pallas_call(
        _ffn_kernel_resident,
        out_shape=jax.ShapeDtypeStruct((m_pad, d_out), out_dtype),
        grid_spec=pltpu.PrefetchScalarGridSpec(
            num_scalar_prefetch=0,
            grid=(m_pad // tile_m,),
            in_specs=[
                pl.BlockSpec((tile_m, d_in), lambda i: (i, 0)),    # x (streamed)
                pl.BlockSpec((d_in, d_mid), const, **w_kw),        # W1 (resident)
                pl.BlockSpec((1, d_mid), const, **w_kw),           # b1
                pl.BlockSpec((d_mid, d_out), const, **w_kw),       # W2 (resident)
                pl.BlockSpec((1, d_out), const, **w_kw),           # b2
            ],
            out_specs=pl.BlockSpec((tile_m, d_out), lambda i: (i, 0)),
        ),
        compiler_params=pltpu.CompilerParams(
            dimension_semantics=("parallel",),
            vmem_limit_bytes=vmem_limit_bytes,
        ),
    )


def _build_call_chunked(m_pad, tile_m, d_in, d_mid, d_out, tk, out_dtype,
                        vmem_limit_bytes):
    return pl.pallas_call(
        _ffn_kernel_chunked,
        out_shape=jax.ShapeDtypeStruct((m_pad, d_out), out_dtype),
        grid_spec=pltpu.PrefetchScalarGridSpec(
            num_scalar_prefetch=0,
            grid=(m_pad // tile_m, d_mid // tk),
            in_specs=[
                pl.BlockSpec((tile_m, d_in), lambda i, k: (i, 0)),  # x (revisited)
                pl.BlockSpec((d_in, tk), lambda i, k: (0, k)),      # W1 col-chunk
                pl.BlockSpec((1, tk), lambda i, k: (0, k)),         # b1 chunk
                pl.BlockSpec((tk, d_out), lambda i, k: (k, 0)),     # W2 row-chunk
                pl.BlockSpec((1, d_out), lambda i, k: (0, 0)),      # b2
            ],
            out_specs=pl.BlockSpec((tile_m, d_out), lambda i, k: (i, 0)),
            scratch_shapes=[pltpu.VMEM((tile_m, d_out), jnp.float32)],
        ),
        compiler_params=pltpu.CompilerParams(
            dimension_semantics=("parallel", "arbitrary"),
            vmem_limit_bytes=vmem_limit_bytes,
        ),
    )


# --------------------------------------------------------------------------
# Factory: one-time weight prep + jitted forward
# --------------------------------------------------------------------------
def make_ffn(w1, b1, w2, b2, *, max_tile_m=512, ff_chunk=None, lane_pack=True):
    """Prepares (caches) weights once and returns a jitted forward(x)->y.

    x: (B, S, H) float32 or bfloat16; output has the same dtype/shape.
    """
    H, FF = w1.shape
    assert w2.shape == (FF, H) and b1.shape == (FF,) and b2.shape == (H,)

    # ---- one-time weight prep (bf16 for MXU rate + half the DMA bytes) ----
    w1b = jnp.asarray(w1, jnp.bfloat16)
    w2b = jnp.asarray(w2, jnp.bfloat16)
    b1f = jnp.asarray(b1, jnp.float32)
    b2f = jnp.asarray(b2, jnp.float32)

    # Lane-density packing: only for genuinely tiny H (kron inflates weight
    # bytes by P^2 and MXU MACs by P -- negligible here, harmful for H ~ 128).
    # For H<=32 pack to 256 lanes so the second dot fills the 256-wide MXU
    # columns on v6e/v7x; otherwise 128.
    pack_p = 1
    if lane_pack and H <= 64:
        target = 256 if H <= 32 else 128
        if target % H == 0:
            pack_p = target // H
    if pack_p > 1:
        eye_bf = jnp.eye(pack_p, dtype=jnp.bfloat16)
        packed = dict(w1=jnp.kron(eye_bf, w1b),
                      w2=jnp.kron(eye_bf, w2b),
                      b1=jnp.tile(b1f, pack_p).reshape(1, -1),
                      b2=jnp.tile(b2f, pack_p).reshape(1, -1))
    else:
        packed = None
    unpacked = dict(w1=w1b, w2=w2b,
                    b1=b1f.reshape(1, -1), b2=b2f.reshape(1, -1))

    single_buf = _single_buffer_supported()

    # Per-core VMEM budget (v7x: 64 MiB/TC; v5e/v6e: 128 MiB). Weights are
    # replicated per TensorCore under "parallel" megacore sharding, and the
    # limit below is per core, so the estimate already matches.
    try:
        vmem_cap = int(pltpu.get_tpu_info().vmem_capacity_bytes)
    except Exception:
        vmem_cap = 64 * 1024 * 1024                      # conservative (v7x per-TC)
    vmem_cap = int(0.8 * vmem_cap)

    def forward(x):
        B, S, H_in = x.shape
        assert H_in == H
        M = B * S
        x2 = x.reshape(M, H)

        use_pack = packed is not None and M % pack_p == 0
        params = packed if use_pack else unpacked
        if use_pack:
            x2 = x2.reshape(M // pack_p, pack_p * H)
        m_rows, d_in = x2.shape
        d_mid = params["w1"].shape[1]
        d_out = params["w2"].shape[1]

        # Row tile: single step for tiny problems; >= 2 grid steps otherwise
        # so both v7x TensorCores are fed; capped at max_tile_m.
        if m_rows <= 256:
            tile_m = _round_up(m_rows, 8)
        elif m_rows <= 2 * max_tile_m:
            tile_m = _round_up((m_rows + 1) // 2, 8)
        else:
            tile_m = max_tile_m
        m_pad = _round_up(m_rows, tile_m)
        if m_pad != m_rows:
            x2 = jnp.pad(x2, ((0, m_pad - m_rows), (0, 0)))

        act_bytes = jnp.dtype(x2.dtype).itemsize
        weight_bufs = 1 if single_buf else 2             # fallback => double-buffered
        est_resident = (2 * tile_m * d_in * act_bytes            # x tiles (2 bufs)
                        + 2 * tile_m * d_out * act_bytes         # out tiles (2 bufs)
                        + tile_m * d_mid * 4                     # h intermediate f32
                        + weight_bufs * (d_in * d_mid + d_mid * d_out) * 2
                        + weight_bufs * (d_mid + d_out) * 4)

        # Path selection: resident weights when they fit; otherwise reduce
        # over FF chunks so VMEM stays bounded regardless of FF / H size.
        use_chunked, tk = False, None
        if ff_chunk is not None and ff_chunk % 128 == 0 and d_mid % ff_chunk == 0:
            use_chunked, tk = True, ff_chunk
        elif int(1.25 * est_resident) > vmem_cap:
            for cand in (2048, 1024, 512, 256, 128):
                if d_mid % cand == 0:
                    use_chunked, tk = True, cand
                    break

        if use_chunked:
            est = (2 * tile_m * d_in * act_bytes
                   + 2 * tile_m * d_out * act_bytes
                   + tile_m * tk * 4                     # h chunk f32
                   + tile_m * d_out * 4                  # acc scratch
                   + 2 * (d_in * tk + tk * d_out) * 2    # streamed weight chunks
                   + 2 * tk * 4 + d_out * 4)             # bias chunks
            vmem_limit = min(max(int(1.25 * est), 16 * 1024 * 1024), vmem_cap)
            call = _build_call_chunked(m_pad, tile_m, d_in, d_mid, d_out, tk,
                                       x2.dtype, vmem_limit)
        else:
            vmem_limit = min(max(int(1.25 * est_resident), 16 * 1024 * 1024),
                             vmem_cap)
            call = _build_call_resident(m_pad, tile_m, d_in, d_mid, d_out,
                                        x2.dtype, vmem_limit, single_buf)

        out_p = call(x2, params["w1"], params["b1"], params["w2"], params["b2"])
        out2 = out_p[:m_rows]
        if use_pack:
            out2 = out2.reshape(M, H)
        return out2.reshape(B, S, H)

    return jax.jit(forward)


# --------------------------------------------------------------------------
# Reference + init helpers
# --------------------------------------------------------------------------
def _init_linear(key, fan_in, fan_out):
    # Mimics torch.nn.Linear init (uniform +/- 1/sqrt(fan_in)).
    kw, kb = jax.random.split(key)
    bound = 1.0 / (fan_in ** 0.5)
    w = jax.random.uniform(kw, (fan_in, fan_out), jnp.float32, -bound, bound)
    b = jax.random.uniform(kb, (fan_out,), jnp.float32, -bound, bound)
    return w, b


def ffn_reference(x, w1, b1, w2, b2):
    h = jnp.maximum(x @ w1 + b1, 0.0)
    return h @ w2 + b2


if __name__ == "__main__":
    # __C.HIDDEN_SIZE = 32, __C.FF_SIZE = 128, __C.DROPOUT_R = 0.1 (identity in eval)
    B, S, H, FF = 2, 8, 32, 128
    key = jax.random.PRNGKey(0)
    kx, k1, k2 = jax.random.split(key, 3)
    x = jax.random.normal(kx, (B, S, H), jnp.float32)
    w1, b1 = _init_linear(k1, H, FF)
    w2, b2 = _init_linear(k2, FF, H)

    ffn = make_ffn(w1, b1, w2, b2)               # one-time weight prep + jit
    out = jax.block_until_ready(ffn(x))
    ref = ffn_reference(x, w1, b1, w2, b2)
    assert out.shape == (B, S, H)
    # bf16 matmul inputs with f32 accumulation -> loosened tolerance vs f32 ref.
    assert jnp.allclose(out, ref, atol=5e-2, rtol=5e-2), \
        float(jnp.max(jnp.abs(out - ref)))

    # Also exercise the FF-chunked reduction path (auto-selected for large FF;
    # forced here via ff_chunk so the accumulator kernel is validated too).
    B2, S2, H2, FF2 = 4, 32, 64, 512
    kx2, k3, k4 = jax.random.split(jax.random.PRNGKey(1), 3)
    xc = jax.random.normal(kx2, (B2, S2, H2), jnp.float32)
    w1c, b1c = _init_linear(k3, H2, FF2)
    w2c, b2c = _init_linear(k4, FF2, H2)
    ffn_c = make_ffn(w1c, b1c, w2c, b2c, ff_chunk=256)
    out_c = jax.block_until_ready(ffn_c(xc))
    ref_c = ffn_reference(xc, w1c, b1c, w2c, b2c)
    assert jnp.allclose(out_c, ref_c, atol=5e-2, rtol=5e-2), \
        float(jnp.max(jnp.abs(out_c - ref_c)))

    print("KERNEL_OK")
</pallas_src>

<mosaic_0001>
module attributes {stable_mosaic.version = 11 : i64} {
  func.func @_ffn_kernel_resident(%arg0: i32, %arg1: memref<8x256xf32, #tpu.memory_space<vmem>>, %arg2: memref<256x1024xbf16, #tpu.memory_space<vmem>>, %arg3: memref<1x1024xf32, #tpu.memory_space<vmem>>, %arg4: memref<1024x256xbf16, #tpu.memory_space<vmem>>, %arg5: memref<1x256xf32, #tpu.memory_space<vmem>>, %arg6: memref<8x256xf32, #tpu.memory_space<vmem>>) attributes {dimension_semantics = [#tpu.dimension_semantics<parallel>], iteration_bounds = array<i64: 1>, scalar_prefetch = 0 : i64, scratch_operands = 0 : i64, tpu.core_type = #tpu.core_type<tc>, window_params = [{transform_indices = @transform_0, window_bounds = array<i64: 8, 256>}, {pipeline_mode = #tpu.pipeline_mode<synchronous>, transform_indices = @transform_1, window_bounds = array<i64: 256, 1024>}, {pipeline_mode = #tpu.pipeline_mode<synchronous>, transform_indices = @transform_2, window_bounds = array<i64: 1, 1024>}, {pipeline_mode = #tpu.pipeline_mode<synchronous>, transform_indices = @transform_3, window_bounds = array<i64: 1024, 256>}, {pipeline_mode = #tpu.pipeline_mode<synchronous>, transform_indices = @transform_4, window_bounds = array<i64: 1, 256>}, {transform_indices = @transform_5, window_bounds = array<i64: 8, 256>}]} {
    %c0 = arith.constant 0 : index
    %c0_0 = arith.constant 0 : index
    %0 = vector.load %arg1[%c0, %c0_0] : memref<8x256xf32, #tpu.memory_space<vmem>>, vector<8x256xf32>
    %1 = arith.truncf %0 : vector<8x256xf32> to vector<8x256xbf16>
    %c0_1 = arith.constant 0 : index
    %c0_2 = arith.constant 0 : index
    %2 = vector.load %arg2[%c0_1, %c0_2] : memref<256x1024xbf16, #tpu.memory_space<vmem>>, vector<256x1024xbf16>
    %cst = arith.constant dense<0.000000e+00> : vector<8x1024xf32>
    %3 = tpu.matmul %1, %2, %cst {dimension_numbers = #tpu.dot_dimension_numbers<[1], [0], [0], [1], [0, 0, 1, 1], [], []>} : vector<8x256xbf16>, vector<256x1024xbf16>, vector<8x1024xf32> -> vector<8x1024xf32>
    %c0_3 = arith.constant 0 : index
    %c0_4 = arith.constant 0 : index
    %4 = vector.load %arg3[%c0_3, %c0_4] : memref<1x1024xf32, #tpu.memory_space<vmem>>, vector<1x1024xf32>
    %5 = vector.broadcast %4 : vector<1x1024xf32> to vector<8x1024xf32>
    %6 = arith.addf %3, %5 : vector<8x1024xf32>
    %cst_5 = arith.constant 0.000000e+00 : f32
    %7 = vector.broadcast %cst_5 : f32 to vector<8x1024xf32>
    %8 = arith.maximumf %6, %7 : vector<8x1024xf32>
    %9 = arith.truncf %8 : vector<8x1024xf32> to vector<8x1024xbf16>
    %c0_6 = arith.constant 0 : index
    %c0_7 = arith.constant 0 : index
    %10 = vector.load %arg4[%c0_6, %c0_7] : memref<1024x256xbf16, #tpu.memory_space<vmem>>, vector<1024x256xbf16>
    %cst_8 = arith.constant dense<0.000000e+00> : vector<8x256xf32>
    %11 = tpu.matmul %9, %10, %cst_8 {dimension_numbers = #tpu.dot_dimension_numbers<[1], [0], [0], [1], [0, 0, 1, 1], [], []>} : vector<8x1024xbf16>, vector<1024x256xbf16>, vector<8x256xf32> -> vector<8x256xf32>
    %c0_9 = arith.constant 0 : index
    %c0_10 = arith.constant 0 : index
    %12 = vector.load %arg5[%c0_9, %c0_10] : memref<1x256xf32, #tpu.memory_space<vmem>>, vector<1x256xf32>
    %13 = vector.broadcast %12 : vector<1x256xf32> to vector<8x256xf32>
    %14 = arith.addf %11, %13 : vector<8x256xf32>
    %c0_11 = arith.constant 0 : index
    %c0_12 = arith.constant 0 : index
    %15 = vector.load %arg6[%c0_11, %c0_12] : memref<8x256xf32, #tpu.memory_space<vmem>>, vector<8x256xf32>
    tpu.vector_store %arg6[%c0_11, %c0_12], %14 {strides = array<i32>} : memref<8x256xf32, #tpu.memory_space<vmem>>, vector<8x256xf32>,
    return
  }
  func.func @transform_0(%arg0: i32) -> (i32, i32) {
    %c0_i32 = arith.constant 0 : i32
    %c0_i32_0 = arith.constant 0 : i32
    return %arg0, %c0_i32 : i32, i32
  }
  func.func @transform_1(%arg0: i32) -> (i32, i32) {
    %c0_i32 = arith.constant 0 : i32
    %c0_i32_0 = arith.constant 0 : i32
    %c0_i32_1 = arith.constant 0 : i32
    return %c0_i32, %c0_i32_0 : i32, i32
  }
  func.func @transform_2(%arg0: i32) -> (i32, i32) {
    %c0_i32 = arith.constant 0 : i32
    %c0_i32_0 = arith.constant 0 : i32
    %c0_i32_1 = arith.constant 0 : i32
    return %c0_i32, %c0_i32_0 : i32, i32
  }
  func.func @transform_3(%arg0: i32) -> (i32, i32) {
    %c0_i32 = arith.constant 0 : i32
    %c0_i32_0 = arith.constant 0 : i32
    %c0_i32_1 = arith.constant 0 : i32
    return %c0_i32, %c0_i32_0 : i32, i32
  }
  func.func @transform_4(%arg0: i32) -> (i32, i32) {
    %c0_i32 = arith.constant 0 : i32
    %c0_i32_0 = arith.constant 0 : i32
    %c0_i32_1 = arith.constant 0 : i32
    return %c0_i32, %c0_i32_0 : i32, i32
  }
  func.func @transform_5(%arg0: i32) -> (i32, i32) {
    %c0_i32 = arith.constant 0 : i32
    %c0_i32_0 = arith.constant 0 : i32
    return %arg0, %c0_i32 : i32, i32
  }
}

</mosaic_0001>

<bundles_post_ra>
// kernel: forward.1
= control target key start
LH: loop header
LB: loop body
LE: loop exit
PB: predicated region body
PF: predicated region fallthrough
CT: control target
= control target key end

     0   :  { %s3282_s1 = inlined_call_operand.vmem [shape: bf16[256,1024], index: 1, kind: input, shape index: {}]   ;;  %s3283_s0 = inlined_call_operand.vmem [shape: f32[8,256], index: 0, kind: input, shape index: {}]   ;;  %s3284_s3 = inlined_call_operand.vmem [shape: bf16[1024,256], index: 3, kind: input, shape index: {}]   ;;  %s3285_s2 = inlined_call_operand.vmem [shape: f32[1,1024], index: 2, kind: input, shape index: {}]   ;;  %s3286_s4 = inlined_call_operand.vmem [shape: f32[1,256], index: 4, kind: input, shape index: {}]   ;;  %s3287_s5 = inlined_call_operand.vmem [shape: f32[8,256], index: 5, kind: output, shape index: {}]  }
   0x1   :  { %v24_v0 = vld [vmem:[%s3282_s1] sm:$0xff]  ;;  %v21_v17 = vld [vmem:[%s3283_s0 + $0x8] sm:$0xff] }
   0x2   :  { %v28_v1 = vld [vmem:[%s3282_s1 + $0x20] sm:$0xff]  ;;  %v2489_v18 = vpack.c.bf16 %v21_v17, %v21_v17 }
   0x3   :  { %v32_v2 = vld [vmem:[%s3282_s1 + $0x40] sm:$0xff]  ;;  %v1965_v3 = vcombine.high %v24_v0, %v28_v1  ;;  %v1964_v4 = vcombine.low %v24_v0, %v28_v1  ;;  %v25_v1 = vld [vmem:[%s3282_s1 + $0x8] sm:$0xff] }
   0x4   :  { %v36_v5 = vld [vmem:[%s3282_s1 + $0x60] sm:$0xff]  ;;  %866 = vmatprep.mubr.bf16.mxu1 %v2489_v18 }
   0x5   :  { %v1973_v6 = vcombine.high %v32_v2, %v36_v5  ;;  %v40_v7 = vld [vmem:[%s3282_s1 + $0x80] sm:$0xff]  ;;  %834 = vmatprep.subr.bf16.mxu1 %v1965_v3  ;;  %v1972_v9 = vcombine.low %v32_v2, %v36_v5  ;;  %v29_v2 = vld [vmem:[%s3282_s1 + $0x28] sm:$0xff] }
   0x6   :  { %v44_v8 = vld [vmem:[%s3282_s1 + $0xa0] sm:$0xff]  ;;  %835 = vmatpush1.bf16.msra.mxu1 %v1964_v4  ;;  %v1967_v5 = vcombine.high %v25_v1, %v29_v2 }
   0x7   :  { %836 = vmatprep.subr.bf16.mxu1 %v1973_v6  ;;  %v1981_v10 = vcombine.high %v40_v7, %v44_v8  ;;  %v48_v11 = vld [vmem:[%s3282_s1 + $0xc0] sm:$0xff]  ;;  %v1980_v13 = vcombine.low %v40_v7, %v44_v8  ;;  %v33_v6 = vld [vmem:[%s3282_s1 + $0x48] sm:$0xff] }
   0x8   :  { %v52_v12 = vld [vmem:[%s3282_s1 + $0xe0] sm:$0xff]  ;;  %v37_v7 = vld [vmem:[%s3282_s1 + $0x68] sm:$0xff] }
   0x9   :  { %v1989_v14 = vcombine.high %v48_v11, %v52_v12  ;;  %v56_v15 = vld [vmem:[%s3282_s1 + $0x100] sm:$0xff]  ;;  %v1988_v19 = vcombine.low %v48_v11, %v52_v12  ;;  %v41_v11 = vld [vmem:[%s3282_s1 + $0x88] sm:$0xff] }
   0xa   :  { %837 = vmatpush1.bf16.msra.mxu1 %v1972_v9  ;;  %v60_v16 = vld [vmem:[%s3282_s1 + $0x120] sm:$0xff]  ;;  %v1966_v9 = vcombine.low %v25_v1, %v29_v2  ;;  %v45_v12 = vld [vmem:[%s3282_s1 + $0xa8] sm:$0xff] }
   0xb   :  { %838 = vmatprep.subr.bf16.mxu1 %v1981_v10  ;;  %v1997_v20 = vcombine.high %v56_v15, %v60_v16  ;;  %v64_v21 = vld [vmem:[%s3282_s1 + $0x140] sm:$0xff]  ;;  %v1996_v23 = vcombine.low %v56_v15, %v60_v16  ;;  %v1975_v10 = vcombine.high %v33_v6, %v37_v7  ;;  %v49_v15 = vld [vmem:[%s3282_s1 + $0xc8] sm:$0xff]  ;;  %v1982_v17 = vcombine.low %v41_v11, %v45_v12 }
   0xc   :  { %v68_v22 = vld [vmem:[%s3282_s1 + $0x160] sm:$0xff]  ;;  %v53_v16 = vld [vmem:[%s3282_s1 + $0xe8] sm:$0xff] }
   0xd   :  { %v2005_v24 = vcombine.high %v64_v21, %v68_v22  ;;  %v72_v25 = vld [vmem:[%s3282_s1 + $0x180] sm:$0xff]  ;;  %v2004_v27 = vcombine.low %v64_v21, %v68_v22  ;;  %v61_v21 = vld [vmem:[%s3282_s1 + $0x128] sm:$0xff]  ;;  %v1990_v22 = vcombine.low %v49_v15, %v53_v16 }
   0xe   :  { %839 = vmatpush1.bf16.msra.mxu1 %v1980_v13  ;;  %v76_v26 = vld [vmem:[%s3282_s1 + $0x1a0] sm:$0xff]  ;;  %v1974_v13 = vcombine.low %v33_v6, %v37_v7  ;;  %v141_v6 = vld [vmem:[%s3282_s1 + $0x3a8] sm:$0xff] }
   0xf   :  { %840 = vmatprep.subr.bf16.mxu1 %v1989_v14  ;;  %v2013_v28 = vcombine.high %v72_v25, %v76_v26  ;;  %v80_v29 = vld [vmem:[%s3282_s1 + $0x1c0] sm:$0xff]  ;;  %v2012_v31 = vcombine.low %v72_v25, %v76_v26  ;;  %v1983_v14 = vcombine.high %v41_v11, %v45_v12  ;;  %v69_v25 = vld [vmem:[%s3282_s1 + $0x168] sm:$0xff] }
  0x10   :  { %v84_v30 = vld [vmem:[%s3282_s1 + $0x1e0] sm:$0xff]  ;;  %v145_v12 = vld [vmem:[%s3282_s1 + $0x3c8] sm:$0xff] }
  0x11   :  { %v2021_v32 = vcombine.high %v80_v29, %v84_v30  ;;  %v88_v33 = vld [vmem:[%s3282_s1 + $0x200] sm:$0xff]  ;;  %v2020_v35 = vcombine.low %v80_v29, %v84_v30  ;;  %v77_v29 = vld [vmem:[%s3282_s1 + $0x1a8] sm:$0xff] }
  0x12   :  { %841 = vmatpush1.bf16.msra.mxu1 %v1988_v19  ;;  %v92_v34 = vld [vmem:[%s3282_s1 + $0x220] sm:$0xff]  ;;  %v1991_v19 = vcombine.high %v49_v15, %v53_v16 }
  0x13   :  { %842 = vmatprep.subr.bf16.mxu1 %v1997_v20  ;;  %v2029_v36 = vcombine.high %v88_v33, %v92_v34  ;;  %v96_v37 = vld [vmem:[%s3282_s1 + $0x240] sm:$0xff]  ;;  %v2028_v39 = vcombine.low %v88_v33, %v92_v34  ;;  %v57_v20 = vld [vmem:[%s3282_s1 + $0x108] sm:$0xff] }
  0x14   :  { %v100_v38 = vld [vmem:[%s3282_s1 + $0x260] sm:$0xff]  ;;  %v1998_v26 = vcombine.low %v57_v20, %v61_v21  ;;  %v85_v33 = vld [vmem:[%s3282_s1 + $0x1e8] sm:$0xff] }
  0x15   :  { %v2037_v40 = vcombine.high %v96_v37, %v100_v38  ;;  %v104_v41 = vld [vmem:[%s3282_s1 + $0x280] sm:$0xff]  ;;  %v2036_v43 = vcombine.low %v96_v37, %v100_v38  ;;  %v93_v37 = vld [vmem:[%s3282_s1 + $0x228] sm:$0xff] }
  0x16   :  { %843 = vmatpush1.bf16.msra.mxu1 %v1996_v23  ;;  %v108_v42 = vld [vmem:[%s3282_s1 + $0x2a0] sm:$0xff]  ;;  %v1999_v23 = vcombine.high %v57_v20, %v61_v21  ;;  %v30_v20 = vld [vmem:[%s3282_s1 + $0x30] sm:$0xff] }
  0x17   :  { %844 = vmatprep.subr.bf16.mxu1 %v2005_v24  ;;  %v2045_v44 = vcombine.high %v104_v41, %v108_v42  ;;  %v112_v45 = vld [vmem:[%s3282_s1 + $0x2c0] sm:$0xff]  ;;  %v2044_v47 = vcombine.low %v104_v41, %v108_v42  ;;  %v65_v24 = vld [vmem:[%s3282_s1 + $0x148] sm:$0xff] }
  0x18   :  { %v116_v46 = vld [vmem:[%s3282_s1 + $0x2e0] sm:$0xff]  ;;  %v2006_v30 = vcombine.low %v65_v24, %v69_v25 }
  0x19   :  { %v2053_v48 = vcombine.high %v112_v45, %v116_v46  ;;  %v120_v49 = vld [vmem:[%s3282_s1 + $0x300] sm:$0xff]  ;;  %v2052_v51 = vcombine.low %v112_v45, %v116_v46  ;;  %v105_v45 = vld [vmem:[%s3282_s1 + $0x288] sm:$0xff] }
  0x1a   :  { %845 = vmatpush1.bf16.msra.mxu1 %v2004_v27  ;;  %v124_v50 = vld [vmem:[%s3282_s1 + $0x320] sm:$0xff]  ;;  %v2007_v27 = vcombine.high %v65_v24, %v69_v25  ;;  %v109_v46 = vld [vmem:[%s3282_s1 + $0x2a8] sm:$0xff]  ;;  %v34_v25 = vld [vmem:[%s3282_s1 + $0x50] sm:$0xff] }
  0x1b   :  { %846 = vmatprep.subr.bf16.mxu1 %v2013_v28  ;;  %v2061_v52 = vcombine.high %v120_v49, %v124_v50  ;;  %v128_v53 = vld [vmem:[%s3282_s1 + $0x340] sm:$0xff]  ;;  %v2060_v55 = vcombine.low %v120_v49, %v124_v50  ;;  %v73_v28 = vld [vmem:[%s3282_s1 + $0x188] sm:$0xff]  ;;  %v2239_v49 = vld [vmem:[%s3284_s3 + $0x10] ss:$8 sps:$4 sm:$0xff]  }
  0x1c   :  { %v132_v54 = vld [vmem:[%s3282_s1 + $0x360] sm:$0xff]  ;;  %v2014_v34 = vcombine.low %v73_v28, %v77_v29 }
  0x1d   :  { %v2069_v56 = vcombine.high %v128_v53, %v132_v54  ;;  %v136_v57 = vld [vmem:[%s3282_s1 + $0x380] sm:$0xff]  ;;  %v2068_v59 = vcombine.low %v128_v53, %v132_v54  ;;  %v2047_v53 = vcombine.high %v105_v45, %v109_v46 }
  0x1e   :  { %847 = vmatpush1.bf16.msra.mxu1 %v2012_v31  ;;  %v140_v58 = vld [vmem:[%s3282_s1 + $0x3a0] sm:$0xff]  ;;  %v2015_v31 = vcombine.high %v73_v28, %v77_v29 }
  0x1f   :  { %848 = vmatprep.subr.bf16.mxu1 %v2021_v32  ;;  %v2077_v60 = vcombine.high %v136_v57, %v140_v58  ;;  %v144_v61 = vld [vmem:[%s3282_s1 + $0x3c0] sm:$0xff]  ;;  %v2076_v63 = vcombine.low %v136_v57, %v140_v58  ;;  %v81_v32 = vld [vmem:[%s3282_s1 + $0x1c8] sm:$0xff] }
  0x20   :  { %v148_v62 = vld [vmem:[%s3282_s1 + $0x3e0] sm:$0xff]  ;;  %v2022_v38 = vcombine.low %v81_v32, %v85_v33  ;;  %v121_v57 = vld [vmem:[%s3282_s1 + $0x308] sm:$0xff] }
  0x21   :  { %v2085_v0 = vcombine.high %v144_v61, %v148_v62  ;;  %v2084_v3 = vcombine.low %v144_v61, %v148_v62  ;;  %v20_v4 = vld [vmem:[%s3283_s0] sm:$0xff]  ;;  %v125_v58 = vld [vmem:[%s3282_s1 + $0x328] sm:$0xff]  ;;  %v2245_v61 = vld [vmem:[%s3284_s3 + $0x30] ss:$8 sps:$4 sm:$0xff]  }
  0x22   :  { %849 = vmatpush1.bf16.msra.mxu1 %v2020_v35  ;;  %v2573_v8 = vpack.c.bf16 %v20_v4, %v20_v4  ;;  %v2023_v35 = vcombine.high %v81_v32, %v85_v33  ;;  %v2234_v42 = vld [vmem:[%s3284_s3 + $0x4] ss:$8 sps:$4 sm:$0xff]   ;;  %v2063_v1 = vcombine.high %v121_v57, %v125_v58  ;;  %v2062_v4 = vcombine.low %v121_v57, %v125_v58  ;;  %v2254_v16 = vld [vmem:[%s3284_s3 + $0x60] ss:$8 sps:$4 sm:$0xff]   ;;  %v46_v32 = vld [vmem:[%s3282_s1 + $0xb0] sm:$0xff] }
  0x23   :  { %850 = vmatprep.subr.bf16.mxu1 %v2029_v36  ;;  %v89_v36 = vld [vmem:[%s3282_s1 + $0x208] sm:$0xff]  ;;  %1794 = vmatprep.subr.bf16.mxu0 %v2234_v42  ;;  %v2267_v42 = vld [vmem:[%s3284_s3 + $0xb4] ss:$8 sps:$4 sm:$0xff]  }
  0x24   :  { %v2031_v41 = vcombine.high %v89_v36, %v93_v37  ;;  %v2240_v54 = vld [vmem:[%s3284_s3 + $0x24] ss:$8 sps:$4 sm:$0xff]   ;;  %v2260_v29 = vld [vmem:[%s3284_s3 + $0x80] ss:$8 sps:$4 sm:$0xff]   ;;  %v74_v57 = vld [vmem:[%s3282_s1 + $0x190] sm:$0xff] }
  0x25   :  { %v2246_v2 = vld [vmem:[%s3284_s3 + $0x44] ss:$8 sps:$4 sm:$0xff]   ;;  %v78_v58 = vld [vmem:[%s3282_s1 + $0x1b0] sm:$0xff] }
  0x26   :  { %851 = vmatpush1.bf16.msra.mxu1 %v2028_v39  ;;  %v97_v39 = vld [vmem:[%s3282_s1 + $0x248] sm:$0xff] }
  0x27   :  { %852 = vmatprep.subr.bf16.mxu1 %v2037_v40  ;;  %v101_v40 = vld [vmem:[%s3282_s1 + $0x268] sm:$0xff] }
  0x28   :  { %v2038_v50 = vcombine.low %v97_v39, %v101_v40  ;;  %v2252_v15 = vld [vmem:[%s3284_s3 + $0x64] ss:$8 sps:$4 sm:$0xff]  }
  0x29   :  { %v2258_v28 = vld [vmem:[%s3284_s3 + $0x84] ss:$8 sps:$4 sm:$0xff]  }
  0x2a   :  { %853 = vmatpush1.bf16.msra.mxu1 %v2036_v43  ;;  %v2236_v43 = vld [vmem:[%s3284_s3] ss:$8 sps:$4 sm:$0xff]  }
  0x2b   :  { %854 = vmatprep.subr.bf16.mxu1 %v2045_v44  ;;  %v2030_v44 = vcombine.low %v89_v36, %v93_v37  ;;  %1795 = vmatpush1.bf16.msra.mxu0 %v2236_v43  ;;  %v2264_v36 = vld [vmem:[%s3284_s3 + $0xa4] ss:$8 sps:$4 sm:$0xff]   ;;  %v2269_v43 = vld [vmem:[%s3284_s3 + $0xb0] ss:$8 sps:$4 sm:$0xff]  }
  0x2e   :  { %855 = vmatpush1.bf16.msra.mxu1 %v2044_v47  ;;  %v2039_v47 = vcombine.high %v97_v39, %v101_v40  ;;  %v54_v40 = vld [vmem:[%s3282_s1 + $0xf0] sm:$0xff] }
  0x2f   :  { %856 = vmatprep.subr.bf16.mxu1 %v2053_v48  ;;  %v2237_v48 = vld [vmem:[%s3284_s3 + $0x14] ss:$8 sps:$4 sm:$0xff]  }
  0x30   :  { %1796 = vmatprep.subr.bf16.mxu0 %v2237_v48 }
  0x31   :  { %1797 = vmatpush1.bf16.msra.mxu0 %v2239_v49  ;;  %v2272_v49 = vld [vmem:[%s3284_s3 + $0xc0] ss:$8 sps:$4 sm:$0xff]  }
  0x32   :  { %857 = vmatpush1.bf16.msra.mxu1 %v2052_v51  ;;  %v113_v51 = vld [vmem:[%s3282_s1 + $0x2c8] sm:$0xff]  ;;  %1798 = vmatprep.subr.bf16.mxu0 %v2240_v54 }
  0x33   :  { %858 = vmatprep.subr.bf16.mxu1 %v2061_v52  ;;  %v117_v52 = vld [vmem:[%s3282_s1 + $0x2e8] sm:$0xff] }
  0x34   :  { %v2054_v62 = vcombine.low %v113_v51, %v117_v52 }
  0x36   :  { %859 = vmatpush1.bf16.msra.mxu1 %v2060_v55  ;;  %v2242_v55 = vld [vmem:[%s3284_s3 + $0x20] ss:$8 sps:$4 sm:$0xff]  }
  0x37   :  { %860 = vmatprep.subr.bf16.mxu1 %v2069_v56  ;;  %v2046_v56 = vcombine.low %v105_v45, %v109_v46  ;;  %1799 = vmatpush1.bf16.msra.mxu0 %v2242_v55  ;;  %v58_v45 = vld [vmem:[%s3282_s1 + $0x110] sm:$0xff] }
  0x38   :  { %v62_v46 = vld [vmem:[%s3282_s1 + $0x130] sm:$0xff] }
  0x39   :  { %v2001_v54 = vcombine.high %v58_v45, %v62_v46  ;;  %v2275_v55 = vld [vmem:[%s3284_s3 + $0xd0] ss:$8 sps:$4 sm:$0xff]  }
  0x3a   :  { %861 = vmatpush1.bf16.msra.mxu1 %v2068_v59  ;;  %v2055_v59 = vcombine.high %v113_v51, %v117_v52  ;;  %v66_v51 = vld [vmem:[%s3282_s1 + $0x150] sm:$0xff] }
  0x3b   :  { %862 = vmatprep.subr.bf16.mxu1 %v2077_v60  ;;  %v2243_v60 = vld [vmem:[%s3284_s3 + $0x34] ss:$8 sps:$4 sm:$0xff]  }
  0x3c   :  { %1800 = vmatprep.subr.bf16.mxu0 %v2243_v60  ;;  %v70_v52 = vld [vmem:[%s3282_s1 + $0x170] sm:$0xff] }
  0x3d   :  { %1801 = vmatpush1.bf16.msra.mxu0 %v2245_v61  ;;  %v2008_v60 = vcombine.low %v66_v51, %v70_v52  ;;  %v82_v61 = vld [vmem:[%s3282_s1 + $0x1d0] sm:$0xff] }
  0x3e   :  { %863 = vmatpush1.bf16.msra.mxu1 %v2076_v63  ;;  %v129_v63 = vld [vmem:[%s3282_s1 + $0x348] sm:$0xff]  ;;  %1802 = vmatprep.subr.bf16.mxu0 %v2246_v2  ;;  %v2016_v2 = vcombine.low %v74_v57, %v78_v58 }
  0x3f   :  { %864 = vmatprep.subr.bf16.mxu1 %v2085_v0  ;;  %v133_v0 = vld [vmem:[%s3282_s1 + $0x368] sm:$0xff] }
  0x40   :  { %v2071_v7 = vcombine.high %v129_v63, %v133_v0  ;;  %v2070_v11 = vcombine.low %v129_v63, %v133_v0  ;;  %v2017_v63 = vcombine.high %v74_v57, %v78_v58  ;;  %v2276_v0 = vld [vmem:[%s3284_s3 + $0xe4] ss:$8 sps:$4 sm:$0xff]   ;;  %v59_v57 = vld [vmem:[%s3282_s1 + $0x118] sm:$0xff] }
  0x42   :  { %865 = vmatpush1.bf16.msra.mxu1 %v2084_v3  ;;  %v2248_v3 = vld [vmem:[%s3284_s3 + $0x40] ss:$8 sps:$4 sm:$0xff]  }
  0x43   :  { %875 = vmatprep.subr.bf16.mxu1 %v1967_v5  ;;  %v137_v5 = vld [vmem:[%s3282_s1 + $0x388] sm:$0xff]  ;;  %1803 = vmatpush1.bf16.msra.mxu0 %v2248_v3 }
  0x45   :  { %867 = vmatmul.mubr.bf16.vlgmr.msra.gmra.mrb[0].mxu1 %v2573_v8 }
  0x46   :  { %876 = vmatpush1.bf16.msra.mxu1 %v1966_v9  ;;  %907 = vmatprep.mubr.bf16.mxu1 %v2489_v18  ;;  %v2249_v9 = vld [vmem:[%s3284_s3 + $0x54] ss:$8 sps:$4 sm:$0xff]  }
  0x47   :  { %877 = vmatprep.subr.bf16.mxu1 %v1975_v10  ;;  %v2251_v10 = vld [vmem:[%s3284_s3 + $0x50] ss:$8 sps:$4 sm:$0xff]   ;;  %1804 = vmatprep.subr.bf16.mxu0 %v2249_v9 }
  0x48   :  { %1805 = vmatpush1.bf16.msra.mxu0 %v2251_v10 }
  0x49   :  { %1806 = vmatprep.subr.bf16.mxu0 %v2252_v15 }
  0x4a   :  { %878 = vmatpush1.bf16.msra.mxu1 %v1974_v13  ;;  %v149_v13 = vld [vmem:[%s3282_s1 + $0x3e8] sm:$0xff] }
  0x4b   :  { %879 = vmatprep.subr.bf16.mxu1 %v1983_v14  ;;  %v2079_v14 = vcombine.high %v137_v5, %v141_v6  ;;  %v2087_v21 = vcombine.high %v145_v12, %v149_v13  ;;  %v2086_v24 = vcombine.low %v145_v12, %v149_v13  ;;  %v98_v12 = vld [vmem:[%s3282_s1 + $0x250] sm:$0xff] }
  0x4c   :  { %1807 = vmatpush1.bf16.msra.mxu0 %v2254_v16  ;;  %v102_v13 = vld [vmem:[%s3282_s1 + $0x270] sm:$0xff] }
  0x4d   :  { %v2041_v15 = vcombine.high %v98_v12, %v102_v13  ;;  %v106_v16 = vld [vmem:[%s3282_s1 + $0x290] sm:$0xff] }
  0x4e   :  { %880 = vmatpush1.bf16.msra.mxu1 %v1982_v17  ;;  %v2078_v17 = vcombine.low %v137_v5, %v141_v6  ;;  %v90_v5 = vld [vmem:[%s3282_s1 + $0x210] sm:$0xff] }
  0x4f   :  { %881 = vmatprep.subr.bf16.mxu1 %v1991_v19  ;;  %v26_v19 = vld [vmem:[%s3282_s1 + $0x10] sm:$0xff] }
  0x50   :  { %v94_v6 = vld [vmem:[%s3282_s1 + $0x230] sm:$0xff] }
  0x51   :  { %v2033_v10 = vcombine.high %v90_v5, %v94_v6 }
  0x52   :  { %882 = vmatpush1.bf16.msra.mxu1 %v1990_v22  ;;  %v2255_v22 = vld [vmem:[%s3284_s3 + $0x74] ss:$8 sps:$4 sm:$0xff]  }
  0x53   :  { %883 = vmatprep.subr.bf16.mxu1 %v1999_v23  ;;  %v2257_v23 = vld [vmem:[%s3284_s3 + $0x70] ss:$8 sps:$4 sm:$0xff]   ;;  %1808 = vmatprep.subr.bf16.mxu0 %v2255_v22 }
  0x54   :  { %1809 = vmatpush1.bf16.msra.mxu0 %v2257_v23  ;;  %v118_v22 = vld [vmem:[%s3282_s1 + $0x2f0] sm:$0xff] }
  0x55   :  { %1810 = vmatprep.subr.bf16.mxu0 %v2258_v28 }
  0x56   :  { %884 = vmatpush1.bf16.msra.mxu1 %v1998_v26  ;;  %v38_v26 = vld [vmem:[%s3282_s1 + $0x70] sm:$0xff] }
  0x57   :  { %885 = vmatprep.subr.bf16.mxu1 %v2007_v27  ;;  %v1969_v27 = vcombine.high %v26_v19, %v30_v20  ;;  %v1977_v33 = vcombine.high %v34_v25, %v38_v26  ;;  %v1976_v37 = vcombine.low %v34_v25, %v38_v26  ;;  %v122_v25 = vld [vmem:[%s3282_s1 + $0x310] sm:$0xff] }
  0x58   :  { %1811 = vmatpush1.bf16.msra.mxu0 %v2260_v29  ;;  %v126_v26 = vld [vmem:[%s3282_s1 + $0x330] sm:$0xff] }
  0x59   :  { %v2065_v28 = vcombine.high %v122_v25, %v126_v26  ;;  %v130_v29 = vld [vmem:[%s3282_s1 + $0x350] sm:$0xff] }
  0x5a   :  { %886 = vmatpush1.bf16.msra.mxu1 %v2006_v30  ;;  %v1968_v30 = vcombine.low %v26_v19, %v30_v20  ;;  %v2040_v19 = vcombine.low %v98_v12, %v102_v13  ;;  %v99_v13 = vld [vmem:[%s3282_s1 + $0x258] sm:$0xff] }
  0x5b   :  { %887 = vmatprep.subr.bf16.mxu1 %v2015_v31  ;;  %v42_v31 = vld [vmem:[%s3282_s1 + $0x90] sm:$0xff] }
  0x5c   :  { %v1985_v39 = vcombine.high %v42_v31, %v46_v32 }
  0x5e   :  { %888 = vmatpush1.bf16.msra.mxu1 %v2014_v34  ;;  %v2261_v34 = vld [vmem:[%s3284_s3 + $0x94] ss:$8 sps:$4 sm:$0xff]  }
  0x5f   :  { %889 = vmatprep.subr.bf16.mxu1 %v2023_v35  ;;  %v2263_v35 = vld [vmem:[%s3284_s3 + $0x90] ss:$8 sps:$4 sm:$0xff]   ;;  %1812 = vmatprep.subr.bf16.mxu0 %v2261_v34 }
  0x60   :  { %1813 = vmatpush1.bf16.msra.mxu0 %v2263_v35  ;;  %v142_v34 = vld [vmem:[%s3282_s1 + $0x3b0] sm:$0xff] }
  0x61   :  { %1814 = vmatprep.subr.bf16.mxu0 %v2264_v36 }
  0x62   :  { %890 = vmatpush1.bf16.msra.mxu1 %v2022_v38  ;;  %v50_v38 = vld [vmem:[%s3282_s1 + $0xd0] sm:$0xff] }
  0x63   :  { %891 = vmatprep.subr.bf16.mxu1 %v2031_v41  ;;  %v2266_v41 = vld [vmem:[%s3284_s3 + $0xa0] ss:$8 sps:$4 sm:$0xff]   ;;  %v1993_v48 = vcombine.high %v50_v38, %v54_v40 }
  0x64   :  { %1815 = vmatpush1.bf16.msra.mxu0 %v2266_v41  ;;  %v27_v41 = vld [vmem:[%s3282_s1 + $0x18] sm:$0xff] }
  0x65   :  { %1816 = vmatprep.subr.bf16.mxu0 %v2267_v42  ;;  %v31_v42 = vld [vmem:[%s3282_s1 + $0x38] sm:$0xff] }
  0x66   :  { %892 = vmatpush1.bf16.msra.mxu1 %v2030_v44  ;;  %v1984_v44 = vcombine.low %v42_v31, %v46_v32  ;;  %v2064_v31 = vcombine.low %v122_v25, %v126_v26  ;;  %v123_v26 = vld [vmem:[%s3282_s1 + $0x318] sm:$0xff] }
  0x67   :  { %893 = vmatprep.subr.bf16.mxu1 %v2039_v47  ;;  %v2270_v47 = vld [vmem:[%s3284_s3 + $0xc4] ss:$8 sps:$4 sm:$0xff]  }
  0x68   :  { %1817 = vmatpush1.bf16.msra.mxu0 %v2269_v43 }
  0x69   :  { %1818 = vmatprep.subr.bf16.mxu0 %v2270_v47  ;;  %v1970_v47 = vcombine.low %v27_v41, %v31_v42 }
  0x6a   :  { %894 = vmatpush1.bf16.msra.mxu1 %v2038_v50  ;;  %v1992_v50 = vcombine.low %v50_v38, %v54_v40  ;;  %v150_v38 = vld [vmem:[%s3282_s1 + $0x3f0] sm:$0xff] }
  0x6b   :  { %895 = vmatprep.subr.bf16.mxu1 %v2047_v53  ;;  %v2273_v53 = vld [vmem:[%s3284_s3 + $0xd4] ss:$8 sps:$4 sm:$0xff]  }
  0x6c   :  { %1819 = vmatpush1.bf16.msra.mxu0 %v2272_v49  ;;  %v43_v49 = vld [vmem:[%s3282_s1 + $0x98] sm:$0xff] }
  0x6d   :  { %1820 = vmatprep.subr.bf16.mxu0 %v2273_v53  ;;  %v51_v53 = vld [vmem:[%s3282_s1 + $0xd8] sm:$0xff] }
  0x6e   :  { %896 = vmatpush1.bf16.msra.mxu1 %v2046_v56  ;;  %v2000_v56 = vcombine.low %v58_v45, %v62_v46  ;;  %v35_v45 = vld [vmem:[%s3282_s1 + $0x58] sm:$0xff] }
  0x6f   :  { %897 = vmatprep.subr.bf16.mxu1 %v2055_v59  ;;  %v2009_v59 = vcombine.high %v66_v51, %v70_v52  ;;  %v39_v46 = vld [vmem:[%s3282_s1 + $0x78] sm:$0xff] }
  0x70   :  { %1821 = vmatpush1.bf16.msra.mxu0 %v2275_v55  ;;  %v1978_v51 = vcombine.low %v35_v45, %v39_v46 }
  0x71   :  { %1822 = vmatprep.subr.bf16.mxu0 %v2276_v0  ;;  %v75_v0 = vld [vmem:[%s3282_s1 + $0x198] sm:$0xff] }
  0x72   :  { %898 = vmatpush1.bf16.msra.mxu1 %v2054_v62  ;;  %v86_v62 = vld [vmem:[%s3282_s1 + $0x1f0] sm:$0xff] }
  0x73   :  { %899 = vmatprep.subr.bf16.mxu1 %v2063_v1  ;;  %v2278_v1 = vld [vmem:[%s3284_s3 + $0xe0] ss:$8 sps:$4 sm:$0xff]   ;;  %v2025_v3 = vcombine.high %v82_v61, %v86_v62  ;;  %v2024_v9 = vcombine.low %v82_v61, %v86_v62  ;;  %v71_v61 = vld [vmem:[%s3282_s1 + $0x178] sm:$0xff] }
  0x74   :  { %1823 = vmatpush1.bf16.msra.mxu0 %v2278_v1  ;;  %v79_v1 = vld [vmem:[%s3282_s1 + $0x1b8] sm:$0xff] }
  0x76   :  { %900 = vmatpush1.bf16.msra.mxu1 %v2062_v4  ;;  %v2279_v4 = vld [vmem:[%s3284_s3 + $0xf4] ss:$8 sps:$4 sm:$0xff]  }
  0x77   :  { %901 = vmatprep.subr.bf16.mxu1 %v2071_v7  ;;  %v2281_v7 = vld [vmem:[%s3284_s3 + $0xf0] ss:$8 sps:$4 sm:$0xff]   ;;  %1824 = vmatprep.subr.bf16.mxu0 %v2279_v4 }
  0x78   :  { %1825 = vmatpush1.bf16.msra.mxu0 %v2281_v7  ;;  %v83_v4 = vld [vmem:[%s3282_s1 + $0x1d8] sm:$0xff] }
  0x7a   :  { %902 = vmatpush1.bf16.msra.mxu1 %v2070_v11  ;;  %v2284_v11 = vld [vmem:[%s3284_s3 + $0x104] ss:$8 sps:$4 sm:$0xff]  }
  0x7b   :  { %903 = vmatprep.subr.bf16.mxu1 %v2079_v14  ;;  %1835 = vmatprep.subr.bf16.mxu0 %v2284_v11  ;;  %v2032_v14 = vcombine.low %v90_v5, %v94_v6  ;;  %v87_v5 = vld [vmem:[%s3282_s1 + $0x1f8] sm:$0xff]  ;;  %v2018_v6 = vcombine.low %v75_v0, %v79_v1 }
  0x7c   :  { %v2027_v7 = vcombine.high %v83_v4, %v87_v5  ;;  %v2026_v11 = vcombine.low %v83_v4, %v87_v5  ;;  %v2297_v4 = vld [vmem:[%s3284_s3 + $0x150] ss:$8 sps:$4 sm:$0xff]   ;;  %v2302_v5 = vld [vmem:[%s3284_s3 + $0x164] ss:$8 sps:$4 sm:$0xff]  }
  0x7e   :  { %904 = vmatpush1.bf16.msra.mxu1 %v2078_v17  ;;  %v110_v17 = vld [vmem:[%s3282_s1 + $0x2b0] sm:$0xff] }
  0x7f   :  { %905 = vmatprep.subr.bf16.mxu1 %v2087_v21  ;;  %v2049_v20 = vcombine.high %v106_v16, %v110_v17  ;;  %v114_v21 = vld [vmem:[%s3282_s1 + $0x2d0] sm:$0xff]  ;;  %v2048_v23 = vcombine.low %v106_v16, %v110_v17  ;;  %v107_v17 = vld [vmem:[%s3282_s1 + $0x298] sm:$0xff] }
  0x82   :  { %906 = vmatpush1.bf16.msra.mxu1 %v2086_v24  ;;  %v2057_v24 = vcombine.high %v114_v21, %v118_v22 }
  0x83   :  { %916 = vmatprep.subr.bf16.mxu1 %v1969_v27  ;;  %v2056_v27 = vcombine.low %v114_v21, %v118_v22  ;;  %v115_v22 = vld [vmem:[%s3282_s1 + $0x2d8] sm:$0xff] }
  0x85   :  { %908 = vmatmul.mubr.bf16.vlgmr.msra.gmra.mrb[4].mxu1 %v2573_v8 }
  0x86   :  { %917 = vmatpush1.bf16.msra.mxu1 %v1968_v30  ;;  %948 = vmatprep.mubr.bf16.mxu1 %v2489_v18  ;;  %v134_v30 = vld [vmem:[%s3282_s1 + $0x370] sm:$0xff] }
  0x87   :  { %918 = vmatprep.subr.bf16.mxu1 %v1977_v33  ;;  %v2073_v32 = vcombine.high %v130_v29, %v134_v30  ;;  %v138_v33 = vld [vmem:[%s3282_s1 + $0x390] sm:$0xff]  ;;  %v2072_v35 = vcombine.low %v130_v29, %v134_v30  ;;  %v131_v30 = vld [vmem:[%s3282_s1 + $0x358] sm:$0xff] }
  0x88   :  { %v2081_v36 = vcombine.high %v138_v33, %v142_v34 }
  0x8a   :  { %919 = vmatpush1.bf16.msra.mxu1 %v1976_v37  ;;  %v146_v37 = vld [vmem:[%s3282_s1 + $0x3d0] sm:$0xff] }
  0x8b   :  { %920 = vmatprep.subr.bf16.mxu1 %v1985_v39  ;;  %v2080_v39 = vcombine.low %v138_v33, %v142_v34  ;;  %v2089_v40 = vcombine.high %v146_v37, %v150_v38  ;;  %v2088_v43 = vcombine.low %v146_v37, %v150_v38  ;;  %v139_v34 = vld [vmem:[%s3282_s1 + $0x398] sm:$0xff] }
  0x8c   :  { %v147_v38 = vld [vmem:[%s3282_s1 + $0x3d8] sm:$0xff] }
  0x8e   :  { %921 = vmatpush1.bf16.msra.mxu1 %v1984_v44  ;;  %v1971_v44 = vcombine.high %v27_v41, %v31_v42 }
  0x8f   :  { %922 = vmatprep.subr.bf16.mxu1 %v1993_v48  ;;  %v1979_v48 = vcombine.high %v35_v45, %v39_v46  ;;  %v2963_v46 = vld [vmem:[%s3285_s2] sm:$0xff] }
  0x92   :  { %923 = vmatpush1.bf16.msra.mxu1 %v1992_v50  ;;  %v47_v50 = vld [vmem:[%s3282_s1 + $0xb8] sm:$0xff] }
  0x93   :  { %924 = vmatprep.subr.bf16.mxu1 %v2001_v54  ;;  %v1987_v52 = vcombine.high %v43_v49, %v47_v50  ;;  %v55_v54 = vld [vmem:[%s3282_s1 + $0xf8] sm:$0xff]  ;;  %v1986_v55 = vcombine.low %v43_v49, %v47_v50 }
  0x94   :  { %v1994_v58 = vcombine.low %v51_v53, %v55_v54 }
  0x96   :  { %925 = vmatpush1.bf16.msra.mxu1 %v2000_v56  ;;  %v1995_v56 = vcombine.high %v51_v53, %v55_v54 }
  0x97   :  { %926 = vmatprep.subr.bf16.mxu1 %v2009_v59 }
  0x9a   :  { %927 = vmatpush1.bf16.msra.mxu1 %v2008_v60  ;;  %v67_v60 = vld [vmem:[%s3282_s1 + $0x158] sm:$0xff] }
  0x9b   :  { %928 = vmatprep.subr.bf16.mxu1 %v2017_v63  ;;  %v2011_v63 = vcombine.high %v67_v60, %v71_v61 }
  0x9e   :  { %929 = vmatpush1.bf16.msra.mxu1 %v2016_v2  ;;  %v2010_v2 = vcombine.low %v67_v60, %v71_v61  ;;  %v2285_v60 = vld [vmem:[%s3284_s3 + $0x110] ss:$8 sps:$4 sm:$0xff]   ;;  %v2290_v61 = vld [vmem:[%s3284_s3 + $0x124] ss:$8 sps:$4 sm:$0xff]  }
  0x9f   :  { %930 = vmatprep.subr.bf16.mxu1 %v2025_v3  ;;  %v2019_v3 = vcombine.high %v75_v0, %v79_v1  ;;  %v2291_v0 = vld [vmem:[%s3284_s3 + $0x130] ss:$8 sps:$4 sm:$0xff]   ;;  %v2296_v1 = vld [vmem:[%s3284_s3 + $0x144] ss:$8 sps:$4 sm:$0xff]  }
  0xa2   :  { %931 = vmatpush1.bf16.msra.mxu1 %v2024_v9  ;;  %v91_v9 = vld [vmem:[%s3282_s1 + $0x218] sm:$0xff] }
  0xa3   :  { %932 = vmatprep.subr.bf16.mxu1 %v2033_v10  ;;  %v95_v10 = vld [vmem:[%s3282_s1 + $0x238] sm:$0xff] }
  0xa4   :  { %v2035_v12 = vcombine.high %v91_v9, %v95_v10 }
  0xa6   :  { %933 = vmatpush1.bf16.msra.mxu1 %v2032_v14  ;;  %v103_v14 = vld [vmem:[%s3282_s1 + $0x278] sm:$0xff] }
  0xa7   :  { %934 = vmatprep.subr.bf16.mxu1 %v2041_v15  ;;  %v2034_v15 = vcombine.low %v91_v9, %v95_v10  ;;  %v2043_v16 = vcombine.high %v99_v13, %v103_v14  ;;  %v2303_v9 = vld [vmem:[%s3284_s3 + $0x170] ss:$8 sps:$4 sm:$0xff]   ;;  %v2308_v10 = vld [vmem:[%s3284_s3 + $0x184] ss:$8 sps:$4 sm:$0xff]  }
  0xaa   :  { %935 = vmatpush1.bf16.msra.mxu1 %v2040_v19  ;;  %v111_v19 = vld [vmem:[%s3282_s1 + $0x2b8] sm:$0xff] }
  0xab   :  { %936 = vmatprep.subr.bf16.mxu1 %v2049_v20  ;;  %v2042_v20 = vcombine.low %v99_v13, %v103_v14  ;;  %v2051_v21 = vcombine.high %v107_v17, %v111_v19  ;;  %v2309_v13 = vld [vmem:[%s3284_s3 + $0x190] ss:$8 sps:$4 sm:$0xff]   ;;  %v2314_v14 = vld [vmem:[%s3284_s3 + $0x1a4] ss:$8 sps:$4 sm:$0xff]  }
  0xae   :  { %937 = vmatpush1.bf16.msra.mxu1 %v2048_v23  ;;  %v119_v23 = vld [vmem:[%s3282_s1 + $0x2f8] sm:$0xff] }
  0xaf   :  { %938 = vmatprep.subr.bf16.mxu1 %v2057_v24  ;;  %v2050_v24 = vcombine.low %v107_v17, %v111_v19  ;;  %v2059_v25 = vcombine.high %v115_v22, %v119_v23  ;;  %v2315_v17 = vld [vmem:[%s3284_s3 + $0x1b0] ss:$8 sps:$4 sm:$0xff]   ;;  %v2320_v19 = vld [vmem:[%s3284_s3 + $0x1c4] ss:$8 sps:$4 sm:$0xff]  }
  0xb2   :  { %939 = vmatpush1.bf16.msra.mxu1 %v2056_v27  ;;  %v127_v27 = vld [vmem:[%s3282_s1 + $0x338] sm:$0xff] }
  0xb3   :  { %940 = vmatprep.subr.bf16.mxu1 %v2065_v28  ;;  %v2058_v28 = vcombine.low %v115_v22, %v119_v23  ;;  %v2067_v29 = vcombine.high %v123_v26, %v127_v27  ;;  %v2321_v23 = vld [vmem:[%s3284_s3 + $0x1d0] ss:$8 sps:$4 sm:$0xff]  }
  0xb6   :  { %941 = vmatpush1.bf16.msra.mxu1 %v2064_v31  ;;  %v135_v31 = vld [vmem:[%s3282_s1 + $0x378] sm:$0xff] }
  0xb7   :  { %942 = vmatprep.subr.bf16.mxu1 %v2073_v32  ;;  %v2066_v32 = vcombine.low %v123_v26, %v127_v27  ;;  %v2075_v33 = vcombine.high %v131_v30, %v135_v31 }
  0xba   :  { %943 = vmatpush1.bf16.msra.mxu1 %v2072_v35  ;;  %v143_v35 = vld [vmem:[%s3282_s1 + $0x3b8] sm:$0xff] }
  0xbb   :  { %944 = vmatprep.subr.bf16.mxu1 %v2081_v36  ;;  %v2074_v36 = vcombine.low %v131_v30, %v135_v31  ;;  %v2083_v37 = vcombine.high %v139_v34, %v143_v35 }
  0xbe   :  { %945 = vmatpush1.bf16.msra.mxu1 %v2080_v39  ;;  %v151_v39 = vld [vmem:[%s3282_s1 + $0x3f8] sm:$0xff] }
  0xbf   :  { %946 = vmatprep.subr.bf16.mxu1 %v2089_v40  ;;  %v2082_v40 = vcombine.low %v139_v34, %v143_v35  ;;  %v2091_v41 = vcombine.high %v147_v38, %v151_v39  ;;  %v2090_v42 = vcombine.low %v147_v38, %v151_v39  ;;  %v2327_v35 = vld [vmem:[%s3284_s3 + $0x1f0] ss:$8 sps:$4 sm:$0xff]   ;;  %v2332_v38 = vld [vmem:[%s3284_s3 + $0x204] ss:$8 sps:$4 sm:$0xff]  }
  0xc2   :  { %947 = vmatpush1.bf16.msra.mxu1 %v2088_v43  ;;  %v154_v43 = vlaneseq }
  0xc3   :  { %957 = vmatprep.subr.bf16.mxu1 %v1971_v44 }
  0xc4   :  { %v2957_v44 = vshrl.u32 %v154_v43, 7  ;;  %v2335_v43 = vld [vmem:[%s3284_s3 + $0x214] ss:$8 sps:$4 sm:$0xff]  }
  0xc5   :  { %949 = vmatmul.mubr.bf16.vlgmr.msra.gmra.mrb[8].mxu1 %v2573_v8 }
  0xc6   :  { %958 = vmatpush1.bf16.msra.mxu1 %v1970_v47  ;;  %989 = vmatprep.mubr.bf16.mxu1 %v2489_v18  ;;  %v63_v18 = vld [vmem:[%s3282_s1 + $0x138] sm:$0xff]  ;;  %v156_v45 = vsub.s32 0, %v2957_v44  ;;  %v160_v47 = vsub.s32 1, %v2957_v44  ;;  %v164_v22 = vsub.s32 2, %v2957_v44 }
  0xc7   :  { %959 = vmatprep.subr.bf16.mxu1 %v1979_v48  ;;  %v2003_v59 = vcombine.high %v59_v57, %v63_v18  ;;  %v2002_v62 = vcombine.low %v59_v57, %v63_v18 }
  0xc8   :  { %v157_v48 = vrot.slane %v2963_v46, %v156_v45  ;;  %v165_v26 = vrot.slane %v2963_v46, %v164_v22 }
  0xca   :  { %960 = vmatpush1.bf16.msra.mxu1 %v1978_v51 }
  0xcb   :  { %961 = vmatprep.subr.bf16.mxu1 %v1987_v52 }
  0xce   :  { %962 = vmatpush1.bf16.msra.mxu1 %v1986_v55 }
  0xcf   :  { %963 = vmatprep.subr.bf16.mxu1 %v1995_v56 }
  0xd2   :  { %964 = vmatpush1.bf16.msra.mxu1 %v1994_v58  ;;  %v2282_v58 = vld [vmem:[%s3284_s3 + $0x100] ss:$8 sps:$4 sm:$0xff]  }
  0xd3   :  { %965 = vmatprep.subr.bf16.mxu1 %v2003_v59  ;;  %v2287_v59 = vld [vmem:[%s3284_s3 + $0x114] ss:$8 sps:$4 sm:$0xff]  }
  0xd6   :  { %966 = vmatpush1.bf16.msra.mxu1 %v2002_v62  ;;  %v2288_v62 = vld [vmem:[%s3284_s3 + $0x120] ss:$8 sps:$4 sm:$0xff]  }
  0xd7   :  { %967 = vmatprep.subr.bf16.mxu1 %v2011_v63  ;;  %v2293_v63 = vld [vmem:[%s3284_s3 + $0x134] ss:$8 sps:$4 sm:$0xff]  }
  0xda   :  { %968 = vmatpush1.bf16.msra.mxu1 %v2010_v2  ;;  %v2294_v2 = vld [vmem:[%s3284_s3 + $0x140] ss:$8 sps:$4 sm:$0xff]  }
  0xdb   :  { %969 = vmatprep.subr.bf16.mxu1 %v2019_v3  ;;  %v2299_v3 = vld [vmem:[%s3284_s3 + $0x154] ss:$8 sps:$4 sm:$0xff]  }
  0xde   :  { %970 = vmatpush1.bf16.msra.mxu1 %v2018_v6  ;;  %v2300_v6 = vld [vmem:[%s3284_s3 + $0x160] ss:$8 sps:$4 sm:$0xff]  }
  0xdf   :  { %971 = vmatprep.subr.bf16.mxu1 %v2027_v7  ;;  %v2305_v7 = vld [vmem:[%s3284_s3 + $0x174] ss:$8 sps:$4 sm:$0xff]  }
  0xe2   :  { %972 = vmatpush1.bf16.msra.mxu1 %v2026_v11  ;;  %v2306_v11 = vld [vmem:[%s3284_s3 + $0x180] ss:$8 sps:$4 sm:$0xff]  }
  0xe3   :  { %973 = vmatprep.subr.bf16.mxu1 %v2035_v12  ;;  %v2311_v12 = vld [vmem:[%s3284_s3 + $0x194] ss:$8 sps:$4 sm:$0xff]  }
  0xe6   :  { %974 = vmatpush1.bf16.msra.mxu1 %v2034_v15  ;;  %v2312_v15 = vld [vmem:[%s3284_s3 + $0x1a0] ss:$8 sps:$4 sm:$0xff]  }
  0xe7   :  { %975 = vmatprep.subr.bf16.mxu1 %v2043_v16  ;;  %v2317_v16 = vld [vmem:[%s3284_s3 + $0x1b4] ss:$8 sps:$4 sm:$0xff]  }
  0xea   :  { %976 = vmatpush1.bf16.msra.mxu1 %v2042_v20  ;;  %v2318_v20 = vld [vmem:[%s3284_s3 + $0x1c0] ss:$8 sps:$4 sm:$0xff]  }
  0xeb   :  { %977 = vmatprep.subr.bf16.mxu1 %v2051_v21  ;;  %v2323_v21 = vld [vmem:[%s3284_s3 + $0x1d4] ss:$8 sps:$4 sm:$0xff]  }
  0xee   :  { %978 = vmatpush1.bf16.msra.mxu1 %v2050_v24  ;;  %v168_v24 = vsub.s32 3, %v2957_v44 }
  0xef   :  { %979 = vmatprep.subr.bf16.mxu1 %v2059_v25  ;;  %v2326_v25 = vld [vmem:[%s3284_s3 + $0x1e4] ss:$8 sps:$4 sm:$0xff]  }
  0xf0   :  { %v169_v27 = vrot.slane %v2963_v46, %v168_v24  ;;  %v2380_v24 = vld [vmem:[%s3284_s3 + $0x304] ss:$8 sps:$4 sm:$0xff]  }
  0xf2   :  { %980 = vmatpush1.bf16.msra.mxu1 %v2058_v28  ;;  %v2324_v28 = vld [vmem:[%s3284_s3 + $0x1e0] ss:$8 sps:$4 sm:$0xff]  }
  0xf3   :  { %981 = vmatprep.subr.bf16.mxu1 %v2067_v29  ;;  %v2329_v29 = vld [vmem:[%s3284_s3 + $0x1f4] ss:$8 sps:$4 sm:$0xff]  }
  0xf6   :  { %982 = vmatpush1.bf16.msra.mxu1 %v2066_v32 }
  0xf7   :  { %983 = vmatprep.subr.bf16.mxu1 %v2075_v33 }
  0xfa   :  { %984 = vmatpush1.bf16.msra.mxu1 %v2074_v36 }
  0xfb   :  { %985 = vmatprep.subr.bf16.mxu1 %v2083_v37 }
  0xfe   :  { %986 = vmatpush1.bf16.msra.mxu1 %v2082_v40 }
  0xff   :  { %987 = vmatprep.subr.bf16.mxu1 %v2091_v41 }
 0x102   :  { %988 = vmatpush1.bf16.msra.mxu1 %v2090_v42  ;;  %v2330_v42 = vld [vmem:[%s3284_s3 + $0x200] ss:$8 sps:$4 sm:$0xff]  }
 0x105   :  { %990 = vmatmul.mubr.bf16.vlgmr.msra.gmra.mrb[12].mxu1 %v2573_v8  ;;  %v161_v8 = vrot.slane %v2963_v46, %v160_v47 }
 0x118   :  { %v868_v49 = vpop.f32.mrb[0].mxu1 }
 0x119   :  { %v869_v50 = vadd.f32 %v868_v49, %v157_v48  ;;  %v870_v51 = vpop.f32.mrb[1].mxu1  ;;  %v2333_v48 = vld [vmem:[%s3284_s3 + $0x210] ss:$8 sps:$4 sm:$0xff]   ;;  %v2336_v49 = vld [vmem:[%s3284_s3 + $0x220] ss:$8 sps:$4 sm:$0xff]  }
 0x11a   :  { %v871_v52 = vadd.f32 %v870_v51, %v161_v8  ;;  %v872_v53 = vpop.f32.mrb[2].mxu1  ;;  %v2338_v8 = vld [vmem:[%s3284_s3 + $0x224] ss:$8 sps:$4 sm:$0xff]   ;;  %v2339_v51 = vld [vmem:[%s3284_s3 + $0x230] ss:$8 sps:$4 sm:$0xff]  }
 0x11b   :  { %v998_v54 = vmax.f32 %v869_v50, 0.0  ;;  %v873_v55 = vpop.f32.mrb[3].mxu1  ;;  %v2341_v50 = vld [vmem:[%s3284_s3 + $0x234] ss:$8 sps:$4 sm:$0xff]   ;;  %v2342_v53 = vld [vmem:[%s3284_s3 + $0x240] ss:$8 sps:$4 sm:$0xff]  }
 0x11c   :  { %v999_v56 = vmax.f32 %v871_v52, 0.0  ;;  %v2344_v52 = vld [vmem:[%s3284_s3 + $0x244] ss:$8 sps:$4 sm:$0xff]   ;;  %v2345_v55 = vld [vmem:[%s3284_s3 + $0x250] ss:$8 sps:$4 sm:$0xff]  }
 0x11d   :  { %v1006_v57 = vpack.c.bf16 %v998_v54, %v998_v54  ;;  %v2347_v54 = vld [vmem:[%s3284_s3 + $0x254] ss:$8 sps:$4 sm:$0xff]  }
 0x11e   :  { %v1007_v18 = vpack.c.bf16 %v999_v56, %v999_v56  ;;  %v2350_v56 = vld [vmem:[%s3284_s3 + $0x264] ss:$8 sps:$4 sm:$0xff]  }
 0x120   :  { %1826 = vmatprep.mubr.bf16.mxu0 %v1007_v18  ;;  %v2353_v18 = vld [vmem:[%s3284_s3 + $0x274] ss:$8 sps:$4 sm:$0xff]  }
 0x121   :  { %1827 = vmatmul.mubr.bf16.vlgmr.msra.gmra.mrb[0].mxu0 %v1006_v57  ;;  %v2348_v57 = vld [vmem:[%s3284_s3 + $0x260] ss:$8 sps:$4 sm:$0xff]  }
 0x122   :  { %1836 = vmatpush1.bf16.msra.mxu0 %v2282_v58  ;;  %v2351_v58 = vld [vmem:[%s3284_s3 + $0x270] ss:$8 sps:$4 sm:$0xff]  }
 0x123   :  { %1837 = vmatprep.subr.bf16.mxu0 %v2287_v59  ;;  %v2356_v59 = vld [vmem:[%s3284_s3 + $0x284] ss:$8 sps:$4 sm:$0xff]  }
 0x126   :  { %1838 = vmatpush1.bf16.msra.mxu0 %v2285_v60  ;;  %v2354_v60 = vld [vmem:[%s3284_s3 + $0x280] ss:$8 sps:$4 sm:$0xff]  }
 0x127   :  { %1839 = vmatprep.subr.bf16.mxu0 %v2290_v61  ;;  %v2359_v61 = vld [vmem:[%s3284_s3 + $0x294] ss:$8 sps:$4 sm:$0xff]  }
 0x12a   :  { %1840 = vmatpush1.bf16.msra.mxu0 %v2288_v62  ;;  %v2357_v62 = vld [vmem:[%s3284_s3 + $0x290] ss:$8 sps:$4 sm:$0xff]  }
 0x12b   :  { %1841 = vmatprep.subr.bf16.mxu0 %v2293_v63  ;;  %v2362_v63 = vld [vmem:[%s3284_s3 + $0x2a4] ss:$8 sps:$4 sm:$0xff]  }
 0x12e   :  { %1842 = vmatpush1.bf16.msra.mxu0 %v2291_v0  ;;  %v2360_v0 = vld [vmem:[%s3284_s3 + $0x2a0] ss:$8 sps:$4 sm:$0xff]  }
 0x12f   :  { %1843 = vmatprep.subr.bf16.mxu0 %v2296_v1  ;;  %v2365_v1 = vld [vmem:[%s3284_s3 + $0x2b4] ss:$8 sps:$4 sm:$0xff]  }
 0x132   :  { %1844 = vmatpush1.bf16.msra.mxu0 %v2294_v2  ;;  %v2363_v2 = vld [vmem:[%s3284_s3 + $0x2b0] ss:$8 sps:$4 sm:$0xff]  }
 0x133   :  { %1845 = vmatprep.subr.bf16.mxu0 %v2299_v3  ;;  %v2368_v3 = vld [vmem:[%s3284_s3 + $0x2c4] ss:$8 sps:$4 sm:$0xff]  }
 0x136   :  { %1846 = vmatpush1.bf16.msra.mxu0 %v2297_v4  ;;  %v2366_v4 = vld [vmem:[%s3284_s3 + $0x2c0] ss:$8 sps:$4 sm:$0xff]  }
 0x137   :  { %1847 = vmatprep.subr.bf16.mxu0 %v2302_v5  ;;  %v2371_v5 = vld [vmem:[%s3284_s3 + $0x2d4] ss:$8 sps:$4 sm:$0xff]  }
 0x13a   :  { %1848 = vmatpush1.bf16.msra.mxu0 %v2300_v6  ;;  %v172_v6 = vsub.s32 4, %v2957_v44 }
 0x13b   :  { %1849 = vmatprep.subr.bf16.mxu0 %v2305_v7  ;;  %v2369_v7 = vld [vmem:[%s3284_s3 + $0x2d0] ss:$8 sps:$4 sm:$0xff]  }
 0x13e   :  { %1850 = vmatpush1.bf16.msra.mxu0 %v2303_v9  ;;  %v176_v9 = vsub.s32 5, %v2957_v44 }
 0x13f   :  { %1851 = vmatprep.subr.bf16.mxu0 %v2308_v10  ;;  %v2374_v10 = vld [vmem:[%s3284_s3 + $0x2e4] ss:$8 sps:$4 sm:$0xff]  }
 0x142   :  { %1852 = vmatpush1.bf16.msra.mxu0 %v2306_v11  ;;  %v173_v11 = vrot.slane %v2963_v46, %v172_v6 }
 0x143   :  { %1853 = vmatprep.subr.bf16.mxu0 %v2311_v12  ;;  %v177_v12 = vrot.slane %v2963_v46, %v176_v9 }
 0x146   :  { %1854 = vmatpush1.bf16.msra.mxu0 %v2309_v13  ;;  %v2372_v13 = vld [vmem:[%s3284_s3 + $0x2e0] ss:$8 sps:$4 sm:$0xff]  }
 0x147   :  { %1855 = vmatprep.subr.bf16.mxu0 %v2314_v14  ;;  %v2377_v14 = vld [vmem:[%s3284_s3 + $0x2f4] ss:$8 sps:$4 sm:$0xff]  }
 0x14a   :  { %1856 = vmatpush1.bf16.msra.mxu0 %v2312_v15 }
 0x14b   :  { %1857 = vmatprep.subr.bf16.mxu0 %v2317_v16 }
 0x14e   :  { %1858 = vmatpush1.bf16.msra.mxu0 %v2315_v17 }
 0x14f   :  { %1859 = vmatprep.subr.bf16.mxu0 %v2320_v19 }
 0x152   :  { %1860 = vmatpush1.bf16.msra.mxu0 %v2318_v20 }
 0x153   :  { %1861 = vmatprep.subr.bf16.mxu0 %v2323_v21  ;;  %v2375_v21 = vld [vmem:[%s3284_s3 + $0x2f0] ss:$8 sps:$4 sm:$0xff]  }
 0x156   :  { %1862 = vmatpush1.bf16.msra.mxu0 %v2321_v23 }
 0x157   :  { %1863 = vmatprep.subr.bf16.mxu0 %v2326_v25 }
 0x158   :  { %v909_v30 = vpop.f32.mrb[4].mxu1 }
 0x159   :  { %v910_v31 = vadd.f32 %v909_v30, %v165_v26  ;;  %v911_v32 = vpop.f32.mrb[5].mxu1  ;;  %v2381_v30 = vld [vmem:[%s3284_s3 + $0x310] ss:$8 sps:$4 sm:$0xff]  }
 0x15a   :  { %v912_v33 = vadd.f32 %v911_v32, %v169_v27  ;;  %v913_v34 = vpop.f32.mrb[6].mxu1  ;;  %1864 = vmatpush1.bf16.msra.mxu0 %v2324_v28  ;;  %v2378_v28 = vld [vmem:[%s3284_s3 + $0x300] ss:$8 sps:$4 sm:$0xff]  }
 0x15b   :  { %v1000_v36 = vmax.f32 %v910_v31, 0.0  ;;  %v914_v37 = vpop.f32.mrb[7].mxu1  ;;  %1865 = vmatprep.subr.bf16.mxu0 %v2329_v29  ;;  %v2383_v29 = vld [vmem:[%s3284_s3 + $0x314] ss:$8 sps:$4 sm:$0xff]   ;;  %v2386_v31 = vld [vmem:[%s3284_s3 + $0x324] ss:$8 sps:$4 sm:$0xff]  }
 0x15c   :  { %v1001_v39 = vmax.f32 %v912_v33, 0.0  ;;  %v2384_v32 = vld [vmem:[%s3284_s3 + $0x320] ss:$8 sps:$4 sm:$0xff]   ;;  %v2389_v33 = vld [vmem:[%s3284_s3 + $0x334] ss:$8 sps:$4 sm:$0xff]  }
 0x15d   :  { %v1008_v40 = vpack.c.bf16 %v1000_v36, %v1000_v36  ;;  %v2387_v34 = vld [vmem:[%s3284_s3 + $0x330] ss:$8 sps:$4 sm:$0xff]   ;;  %v2390_v36 = vld [vmem:[%s3284_s3 + $0x340] ss:$8 sps:$4 sm:$0xff]   ;;  %v2395_v37 = vld [vmem:[%s3284_s3 + $0x354] ss:$8 sps:$4 sm:$0xff]  }
 0x15e   :  { %v1009_v41 = vpack.c.bf16 %v1001_v39, %v1001_v39  ;;  %1866 = vmatpush1.bf16.msra.mxu0 %v2327_v35  ;;  %v2392_v35 = vld [vmem:[%s3284_s3 + $0x344] ss:$8 sps:$4 sm:$0xff]  }
 0x15f   :  { %1876 = vmatprep.subr.bf16.mxu0 %v2332_v38  ;;  %v2393_v38 = vld [vmem:[%s3284_s3 + $0x350] ss:$8 sps:$4 sm:$0xff]   ;;  %v2398_v39 = vld [vmem:[%s3284_s3 + $0x364] ss:$8 sps:$4 sm:$0xff]  }
 0x160   :  { %1867 = vmatprep.mubr.bf16.mxu0 %v1009_v41  ;;  %v2401_v41 = vld [vmem:[%s3284_s3 + $0x374] ss:$8 sps:$4 sm:$0xff]  }
 0x161   :  { %1868 = vmatmul.mubr.bf16.vlgmr.msra.gmra.mrb[0].mxu0 %v1008_v40  ;;  %v2396_v40 = vld [vmem:[%s3284_s3 + $0x360] ss:$8 sps:$4 sm:$0xff]  }
 0x162   :  { %1877 = vmatpush1.bf16.msra.mxu0 %v2330_v42  ;;  %v2399_v42 = vld [vmem:[%s3284_s3 + $0x370] ss:$8 sps:$4 sm:$0xff]  }
 0x163   :  { %1878 = vmatprep.subr.bf16.mxu0 %v2335_v43  ;;  %v2404_v43 = vld [vmem:[%s3284_s3 + $0x384] ss:$8 sps:$4 sm:$0xff]  }
 0x166   :  { %1879 = vmatpush1.bf16.msra.mxu0 %v2333_v48  ;;  %v2402_v48 = vld [vmem:[%s3284_s3 + $0x380] ss:$8 sps:$4 sm:$0xff]  }
 0x167   :  { %1880 = vmatprep.subr.bf16.mxu0 %v2338_v8  ;;  %v2407_v8 = vld [vmem:[%s3284_s3 + $0x394] ss:$8 sps:$4 sm:$0xff]  }
 0x16a   :  { %1881 = vmatpush1.bf16.msra.mxu0 %v2336_v49  ;;  %v2405_v49 = vld [vmem:[%s3284_s3 + $0x390] ss:$8 sps:$4 sm:$0xff]  }
 0x16b   :  { %1882 = vmatprep.subr.bf16.mxu0 %v2341_v50  ;;  %v2410_v50 = vld [vmem:[%s3284_s3 + $0x3a4] ss:$8 sps:$4 sm:$0xff]  }
 0x16e   :  { %1883 = vmatpush1.bf16.msra.mxu0 %v2339_v51  ;;  %v2408_v51 = vld [vmem:[%s3284_s3 + $0x3a0] ss:$8 sps:$4 sm:$0xff]  }
 0x16f   :  { %1884 = vmatprep.subr.bf16.mxu0 %v2344_v52  ;;  %v2413_v52 = vld [vmem:[%s3284_s3 + $0x3b4] ss:$8 sps:$4 sm:$0xff]  }
 0x172   :  { %1885 = vmatpush1.bf16.msra.mxu0 %v2342_v53  ;;  %v2411_v53 = vld [vmem:[%s3284_s3 + $0x3b0] ss:$8 sps:$4 sm:$0xff]  }
 0x173   :  { %1886 = vmatprep.subr.bf16.mxu0 %v2347_v54  ;;  %v2416_v54 = vld [vmem:[%s3284_s3 + $0x3c4] ss:$8 sps:$4 sm:$0xff]  }
 0x176   :  { %1887 = vmatpush1.bf16.msra.mxu0 %v2345_v55  ;;  %v2414_v55 = vld [vmem:[%s3284_s3 + $0x3c0] ss:$8 sps:$4 sm:$0xff]  }
 0x177   :  { %1888 = vmatprep.subr.bf16.mxu0 %v2350_v56  ;;  %v2419_v56 = vld [vmem:[%s3284_s3 + $0x3d4] ss:$8 sps:$4 sm:$0xff]  }
 0x17a   :  { %1889 = vmatpush1.bf16.msra.mxu0 %v2348_v57  ;;  %v180_v57 = vsub.s32 6, %v2957_v44 }
 0x17b   :  { %1890 = vmatprep.subr.bf16.mxu0 %v2353_v18  ;;  %v2417_v18 = vld [vmem:[%s3284_s3 + $0x3d0] ss:$8 sps:$4 sm:$0xff]  }
 0x17e   :  { %1891 = vmatpush1.bf16.msra.mxu0 %v2351_v58  ;;  %v184_v58 = vsub.s32 7, %v2957_v44 }
 0x17f   :  { %1892 = vmatprep.subr.bf16.mxu0 %v2356_v59  ;;  %v2422_v59 = vld [vmem:[%s3284_s3 + $0x3e4] ss:$8 sps:$4 sm:$0xff]  }
 0x182   :  { %1893 = vmatpush1.bf16.msra.mxu0 %v2354_v60  ;;  %v181_v60 = vrot.slane %v2963_v46, %v180_v57 }
 0x183   :  { %1894 = vmatprep.subr.bf16.mxu0 %v2359_v61  ;;  %v185_v61 = vrot.slane %v2963_v46, %v184_v58 }
 0x186   :  { %1895 = vmatpush1.bf16.msra.mxu0 %v2357_v62  ;;  %v2420_v62 = vld [vmem:[%s3284_s3 + $0x3e0] ss:$8 sps:$4 sm:$0xff]  }
 0x187   :  { %1896 = vmatprep.subr.bf16.mxu0 %v2362_v63  ;;  %v2425_v63 = vld [vmem:[%s3284_s3 + $0x3f4] ss:$8 sps:$4 sm:$0xff]  }
 0x18a   :  { %1897 = vmatpush1.bf16.msra.mxu0 %v2360_v0 }
 0x18b   :  { %1898 = vmatprep.subr.bf16.mxu0 %v2365_v1 }
 0x18e   :  { %1899 = vmatpush1.bf16.msra.mxu0 %v2363_v2 }
 0x18f   :  { %1900 = vmatprep.subr.bf16.mxu0 %v2368_v3 }
 0x192   :  { %1901 = vmatpush1.bf16.msra.mxu0 %v2366_v4 }
 0x193   :  { %1902 = vmatprep.subr.bf16.mxu0 %v2371_v5  ;;  %v2423_v5 = vld [vmem:[%s3284_s3 + $0x3f0] ss:$8 sps:$4 sm:$0xff]  }
 0x196   :  { %1903 = vmatpush1.bf16.msra.mxu0 %v2369_v7 }
 0x197   :  { %1904 = vmatprep.subr.bf16.mxu0 %v2374_v10 }
 0x198   :  { %v950_v15 = vpop.f32.mrb[8].mxu1 }
 0x199   :  { %v951_v16 = vadd.f32 %v950_v15, %v173_v11  ;;  %v952_v17 = vpop.f32.mrb[9].mxu1  ;;  %v1142_v11 = vld [vmem:[%s3286_s4] sm:$0x3] }
 0x19a   :  { %v953_v19 = vadd.f32 %v952_v17, %v177_v12  ;;  %v954_v20 = vpop.f32.mrb[10].mxu1  ;;  %1905 = vmatpush1.bf16.msra.mxu0 %v2372_v13  ;;  %v1147_v12 = vrot.slane %v1142_v11, %v156_v45  ;;  %v1151_v13 = vrot.slane %v1142_v11, %v160_v47 }
 0x19b   :  { %v1002_v22 = vmax.f32 %v951_v16, 0.0  ;;  %v955_v23 = vpop.f32.mrb[11].mxu1  ;;  %1906 = vmatprep.subr.bf16.mxu0 %v2377_v14 }
 0x19c   :  { %v1003_v25 = vmax.f32 %v953_v19, 0.0 }
 0x19d   :  { %v1010_v26 = vpack.c.bf16 %v1002_v22, %v1002_v22 }
 0x19e   :  { %v1011_v27 = vpack.c.bf16 %v1003_v25, %v1003_v25  ;;  %1907 = vmatpush1.bf16.msra.mxu0 %v2375_v21 }
 0x19f   :  { %1917 = vmatprep.subr.bf16.mxu0 %v2380_v24 }
 0x1a0   :  { %1908 = vmatprep.mubr.bf16.mxu0 %v1011_v27 }
 0x1a1   :  { %1909 = vmatmul.mubr.bf16.vlgmr.msra.gmra.mrb[0].mxu0 %v1010_v26 }
 0x1a2   :  { %1918 = vmatpush1.bf16.msra.mxu0 %v2378_v28 }
 0x1a3   :  { %1919 = vmatprep.subr.bf16.mxu0 %v2383_v29 }
 0x1a6   :  { %1920 = vmatpush1.bf16.msra.mxu0 %v2381_v30 }
 0x1a7   :  { %1921 = vmatprep.subr.bf16.mxu0 %v2386_v31 }
 0x1aa   :  { %1922 = vmatpush1.bf16.msra.mxu0 %v2384_v32 }
 0x1ab   :  { %1923 = vmatprep.subr.bf16.mxu0 %v2389_v33 }
 0x1ae   :  { %1924 = vmatpush1.bf16.msra.mxu0 %v2387_v34 }
 0x1af   :  { %1925 = vmatprep.subr.bf16.mxu0 %v2392_v35 }
 0x1b2   :  { %1926 = vmatpush1.bf16.msra.mxu0 %v2390_v36 }
 0x1b3   :  { %1927 = vmatprep.subr.bf16.mxu0 %v2395_v37 }
 0x1b6   :  { %1928 = vmatpush1.bf16.msra.mxu0 %v2393_v38 }
 0x1b7   :  { %1929 = vmatprep.subr.bf16.mxu0 %v2398_v39 }
 0x1ba   :  { %1930 = vmatpush1.bf16.msra.mxu0 %v2396_v40 }
 0x1bb   :  { %1931 = vmatprep.subr.bf16.mxu0 %v2401_v41 }
 0x1be   :  { %1932 = vmatpush1.bf16.msra.mxu0 %v2399_v42 }
 0x1bf   :  { %1933 = vmatprep.subr.bf16.mxu0 %v2404_v43 }
 0x1c2   :  { %1934 = vmatpush1.bf16.msra.mxu0 %v2402_v48 }
 0x1c3   :  { %1935 = vmatprep.subr.bf16.mxu0 %v2407_v8 }
 0x1c6   :  { %1936 = vmatpush1.bf16.msra.mxu0 %v2405_v49 }
 0x1c7   :  { %1937 = vmatprep.subr.bf16.mxu0 %v2410_v50 }
 0x1ca   :  { %1938 = vmatpush1.bf16.msra.mxu0 %v2408_v51 }
 0x1cb   :  { %1939 = vmatprep.subr.bf16.mxu0 %v2413_v52 }
 0x1ce   :  { %1940 = vmatpush1.bf16.msra.mxu0 %v2411_v53 }
 0x1cf   :  { %1941 = vmatprep.subr.bf16.mxu0 %v2416_v54 }
 0x1d2   :  { %1942 = vmatpush1.bf16.msra.mxu0 %v2414_v55 }
 0x1d3   :  { %1943 = vmatprep.subr.bf16.mxu0 %v2419_v56 }
 0x1d6   :  { %1944 = vmatpush1.bf16.msra.mxu0 %v2417_v18 }
 0x1d7   :  { %1945 = vmatprep.subr.bf16.mxu0 %v2422_v59 }
 0x1d8   :  { %v991_v0 = vpop.f32.mrb[12].mxu1 }
 0x1d9   :  { %v992_v1 = vadd.f32 %v991_v0, %v181_v60  ;;  %v993_v2 = vpop.f32.mrb[13].mxu1 }
 0x1da   :  { %v994_v3 = vadd.f32 %v993_v2, %v185_v61  ;;  %v995_v4 = vpop.f32.mrb[14].mxu1  ;;  %1946 = vmatpush1.bf16.msra.mxu0 %v2420_v62 }
 0x1db   :  { %v1004_v46 = vmax.f32 %v992_v1, 0.0  ;;  %v996_v6 = vpop.f32.mrb[15].mxu1  ;;  %1947 = vmatprep.subr.bf16.mxu0 %v2425_v63 }
 0x1dc   :  { %v1005_v7 = vmax.f32 %v994_v3, 0.0 }
 0x1dd   :  { %v1012_v10 = vpack.c.bf16 %v1004_v46, %v1004_v46 }
 0x1de   :  { %v1013_v9 = vpack.c.bf16 %v1005_v7, %v1005_v7  ;;  %1948 = vmatpush1.bf16.msra.mxu0 %v2423_v5 }
 0x1e0   :  { %1949 = vmatprep.mubr.bf16.mxu0 %v1013_v9 }
 0x1e1   :  { %1950 = vmatmul.mubr.bf16.vlgmr.msra.gmra.mrb[0].mxu0 %v1012_v10 }
 0x2b4   :  { %v1951_v14 = vpop.f32.mrb[0].mxu0 }
 0x2b5   :  { %v2220_v15 = vadd.f32 %v1951_v14, %v1147_v12  ;;  %v1953_v16 = vpop.f32.mrb[1].mxu0 }
 0x2b6   :  { %v2221_v17 = vadd.f32 %v1953_v16, %v1151_v13  ;;  %v1955_v19 = vpop.f32.mrb[2].mxu0 }
 0x2b7   :  { %1958 = vst [vmem:[%s3287_s5] sm:$0xff] %v2220_v15  ;;  %v1956_v20 = vpop.f32.mrb[3].mxu0 }
 0x2b8   :  { %1959 = vst [vmem:[%s3287_s5 + $0x8] sm:$0xff] %v2221_v17 }

</bundles_post_ra>
